<compile_context>
chip_gen: v6e
topology: v6e:2x2x1
jax: 0.10.0
libtpu: 0.0.40
codegen_flags: <defaults>
</compile_context>

<pallas_src>
import functools
import jax
import jax.numpy as jnp
from jax.experimental import pallas as pl
from jax.experimental.pallas import tpu as pltpu


# --------------------------------------------------------------------------- #
# Helpers
# --------------------------------------------------------------------------- #
def _layernorm(x, w, b, eps=1e-6):
    """x: (rows, C) fp32; w, b: (1, C). Returns fp32."""
    mu = jnp.mean(x, axis=-1, keepdims=True)
    xc = x - mu
    var = jnp.mean(xc * xc, axis=-1, keepdims=True)
    return xc * jax.lax.rsqrt(var + eps) * w.astype(jnp.float32) + b.astype(jnp.float32)


def _pick_tile(n, target):
    """Largest tile <= target that divides n and is a multiple of 8, else n (full)."""
    if n <= target:
        return n
    for t in range(target, 7, -8):
        if n % t == 0:
            return t
    return n


def _vmem_limit_bytes():
    try:
        cap = int(pltpu.get_tpu_info().vmem_capacity_bytes)
    except Exception:
        cap = 128 << 20
    return min(cap * 3 // 4, 100 << 20)


# --------------------------------------------------------------------------- #
# Kernel 1: LN1 + QKV projection
# --------------------------------------------------------------------------- #
def ln_qkv_kernel(x_ref, ln1w_ref, ln1b_ref, wq_ref, wk_ref, wv_ref,
                  q_ref, k_ref, v_ref):
    x = x_ref[0].astype(jnp.float32)                         # (tq, C) fp32 stats
    xn = _layernorm(x, ln1w_ref[...], ln1b_ref[...]).astype(x_ref.dtype)
    q_ref[0] = jnp.dot(xn, wq_ref[...],
                       preferred_element_type=jnp.float32).astype(q_ref.dtype)
    k_ref[0] = jnp.dot(xn, wk_ref[...],
                       preferred_element_type=jnp.float32).astype(k_ref.dtype)
    v_ref[0] = jnp.dot(xn, wv_ref[...],
                       preferred_element_type=jnp.float32).astype(v_ref.dtype)


# --------------------------------------------------------------------------- #
# Kernel 2: flash attention + proj + residual + LN2 + MLP
# --------------------------------------------------------------------------- #
def attn_mlp_kernel(x_ref, q_ref, k_ref, v_ref,
                    wproj_ref, bproj_ref, ln2w_ref, ln2b_ref,
                    wfc1_ref, bfc1_ref, wfc2_ref, bfc2_ref,
                    out_ref, m_ref, l_ref, acc_ref, *, num_heads):
    ki = pl.program_id(2)
    n_kv = pl.num_programs(2)
    C = x_ref.shape[-1]
    H = num_heads
    hd = C // H
    cdt = q_ref.dtype                                        # matmul operand dtype

    @pl.when(ki == 0)
    def _init():
        m_ref[...] = jnp.full(m_ref.shape, -jnp.inf, jnp.float32)
        l_ref[...] = jnp.zeros(l_ref.shape, jnp.float32)
        acc_ref[...] = jnp.zeros(acc_ref.shape, jnp.float32)

    q = q_ref[0]                                             # (tq, C), pre-scaled
    k = k_ref[0]                                             # (tkv, C)
    v = v_ref[0]                                             # (tkv, C)

    # Load running state once (full, lane-dense), update per head in registers,
    # write back once (full, lane-dense).
    m_prev_all = m_ref[...]                                  # (tq, H)
    l_prev_all = l_ref[...]                                  # (tq, H)
    acc_prev = acc_ref[...]                                  # (tq, C)

    m_cols, l_cols, acc_cols = [], [], []
    for h in range(H):
        cs = slice(h * hd, (h + 1) * hd)
        s = jax.lax.dot_general(q[:, cs], k[:, cs],
                                (((1,), (1,)), ((), ())),
                                preferred_element_type=jnp.float32)   # (tq, tkv)
        m_prev = m_prev_all[:, h:h + 1]                                # (tq, 1)
        m_new = jnp.maximum(m_prev, jnp.max(s, axis=-1, keepdims=True))
        alpha = jnp.exp(m_prev - m_new)
        p = jnp.exp(s - m_new)                                         # fp32
        l_new = alpha * l_prev_all[:, h:h + 1] + jnp.sum(p, axis=-1, keepdims=True)
        acc_new = alpha * acc_prev[:, cs] + jax.lax.dot_general(
            p.astype(cdt), v[:, cs], (((1,), (0,)), ((), ())),
            preferred_element_type=jnp.float32)
        m_cols.append(m_new)
        l_cols.append(l_new)
        acc_cols.append(acc_new)

    m_ref[...] = jnp.concatenate(m_cols, axis=-1)
    l_ref[...] = jnp.concatenate(l_cols, axis=-1)
    acc_ref[...] = jnp.concatenate(acc_cols, axis=-1)

    @pl.when(ki == n_kv - 1)
    def _finish():
        # Normalize each head's accumulator (approx reciprocal -> EUP slot).
        inv_l = pl.reciprocal(l_ref[...], approx=True)                 # (tq, H)
        acc = acc_ref[...]                                             # (tq, C)
        attn_out = jnp.concatenate(
            [acc[:, h * hd:(h + 1) * hd] * inv_l[:, h:h + 1] for h in range(H)],
            axis=-1).astype(cdt)                                       # (tq, C)

        x = x_ref[0].astype(jnp.float32)                               # (tq, C)

        o = jnp.dot(attn_out, wproj_ref[...],
                    preferred_element_type=jnp.float32) + bproj_ref[...]
        x1 = x + o                                                     # residual 1

        xn2 = _layernorm(x1, ln2w_ref[...], ln2b_ref[...]).astype(cdt)
        hmid = jnp.dot(xn2, wfc1_ref[...],
                       preferred_element_type=jnp.float32) + bfc1_ref[...]
        hmid = jax.nn.gelu(hmid, approximate=False)                    # exact (erf) GELU
        mlp = jnp.dot(hmid.astype(cdt), wfc2_ref[...],
                      preferred_element_type=jnp.float32) + bfc2_ref[...]

        out_ref[0] = (x1 + mlp).astype(out_ref.dtype)                  # residual 2


# --------------------------------------------------------------------------- #
# Wrapper
# --------------------------------------------------------------------------- #
def block_forward(x, params, num_heads, *, q_tile=256, kv_tile=256):
    B, N, C = x.shape
    assert C % num_heads == 0, "dim must be divisible by num_heads"
    hd = C // num_heads
    scale = float(hd) ** -0.5
    hidden = params['wfc1'].shape[1]
    dt = x.dtype

    tq = _pick_tile(N, q_tile)
    tkv = _pick_tile(N, kv_tile)
    nq = N // tq
    nkv = N // tkv

    # Split QKV weight; fold the softmax scale into the Q columns (free).
    wqkv = params['wqkv']
    wq = (wqkv[:, 0 * C:1 * C] * scale).astype(wqkv.dtype)
    wk = wqkv[:, 1 * C:2 * C]
    wv = wqkv[:, 2 * C:3 * C]

    # 1-D params as lane-major (1, C)/(1, hidden) rows.
    def row(p):
        return p.reshape(1, -1)

    ln1_w, ln1_b = row(params['ln1_w']), row(params['ln1_b'])
    ln2_w, ln2_b = row(params['ln2_w']), row(params['ln2_b'])
    bproj, bfc1, bfc2 = row(params['bproj']), row(params['bfc1']), row(params['bfc2'])

    vmem_limit = _vmem_limit_bytes()

    # ---- Kernel 1: LN1 + QKV projection ------------------------------------
    qkv_out_shape = jax.ShapeDtypeStruct((B, N, C), dt)
    q, k, v = pl.pallas_call(
        ln_qkv_kernel,
        out_shape=(qkv_out_shape, qkv_out_shape, qkv_out_shape),
        grid_spec=pltpu.PrefetchScalarGridSpec(
            num_scalar_prefetch=0,
            grid=(B, nq),
            in_specs=[
                pl.BlockSpec((1, tq, C), lambda b, i: (b, i, 0)),   # x
                pl.BlockSpec((1, C), lambda b, i: (0, 0)),          # ln1_w
                pl.BlockSpec((1, C), lambda b, i: (0, 0)),          # ln1_b
                pl.BlockSpec((C, C), lambda b, i: (0, 0)),          # wq (scaled)
                pl.BlockSpec((C, C), lambda b, i: (0, 0)),          # wk
                pl.BlockSpec((C, C), lambda b, i: (0, 0)),          # wv
            ],
            out_specs=(
                pl.BlockSpec((1, tq, C), lambda b, i: (b, i, 0)),
                pl.BlockSpec((1, tq, C), lambda b, i: (b, i, 0)),
                pl.BlockSpec((1, tq, C), lambda b, i: (b, i, 0)),
            ),
        ),
        compiler_params=pltpu.CompilerParams(
            dimension_semantics=("parallel", "parallel"),
            vmem_limit_bytes=vmem_limit),
    )(x, ln1_w, ln1_b, wq, wk, wv)

    # ---- Kernel 2: flash attention + proj + residuals + MLP ----------------
    kernel2 = functools.partial(attn_mlp_kernel, num_heads=num_heads)
    out = pl.pallas_call(
        kernel2,
        out_shape=jax.ShapeDtypeStruct((B, N, C), dt),
        grid_spec=pltpu.PrefetchScalarGridSpec(
            num_scalar_prefetch=0,
            grid=(B, nq, nkv),
            in_specs=[
                pl.BlockSpec((1, tq, C), lambda b, qi, ki: (b, qi, 0)),   # x (residual)
                pl.BlockSpec((1, tq, C), lambda b, qi, ki: (b, qi, 0)),   # q
                pl.BlockSpec((1, tkv, C), lambda b, qi, ki: (b, ki, 0)),  # k
                pl.BlockSpec((1, tkv, C), lambda b, qi, ki: (b, ki, 0)),  # v
                pl.BlockSpec((C, C), lambda b, qi, ki: (0, 0)),           # wproj
                pl.BlockSpec((1, C), lambda b, qi, ki: (0, 0)),           # bproj
                pl.BlockSpec((1, C), lambda b, qi, ki: (0, 0)),           # ln2_w
                pl.BlockSpec((1, C), lambda b, qi, ki: (0, 0)),           # ln2_b
                pl.BlockSpec((C, hidden), lambda b, qi, ki: (0, 0)),      # wfc1
                pl.BlockSpec((1, hidden), lambda b, qi, ki: (0, 0)),      # bfc1
                pl.BlockSpec((hidden, C), lambda b, qi, ki: (0, 0)),      # wfc2
                pl.BlockSpec((1, C), lambda b, qi, ki: (0, 0)),           # bfc2
            ],
            out_specs=pl.BlockSpec((1, tq, C), lambda b, qi, ki: (b, qi, 0)),
            scratch_shapes=[
                pltpu.VMEM((tq, num_heads), jnp.float32),   # running max
                pltpu.VMEM((tq, num_heads), jnp.float32),   # running denominator
                pltpu.VMEM((tq, C), jnp.float32),           # output accumulator
            ],
        ),
        compiler_params=pltpu.CompilerParams(
            dimension_semantics=("parallel", "parallel", "arbitrary"),
            vmem_limit_bytes=vmem_limit),
    )(x, q, k, v,
      params['wproj'], bproj, ln2_w, ln2_b,
      params['wfc1'], bfc1, params['wfc2'], bfc2)
    return out


# --------------------------------------------------------------------------- #
# Pure-JAX reference mirroring the PyTorch Block forward
# --------------------------------------------------------------------------- #
def reference_forward(x, params, num_heads):
    B, N, C = x.shape
    H = num_heads
    hd = C // H
    scale = float(hd) ** -0.5

    def ln(v, w, b):
        mu = jnp.mean(v, axis=-1, keepdims=True)
        var = jnp.mean((v - mu) ** 2, axis=-1, keepdims=True)
        return (v - mu) / jnp.sqrt(var + 1e-6) * w + b

    xn = ln(x, params['ln1_w'], params['ln1_b'])
    qkv = xn @ params['wqkv']
    q, k, v = jnp.split(qkv, 3, axis=-1)
    q = q.reshape(B, N, H, hd).transpose(0, 2, 1, 3)
    k = k.reshape(B, N, H, hd).transpose(0, 2, 1, 3)
    v = v.reshape(B, N, H, hd).transpose(0, 2, 1, 3)
    attn = jax.nn.softmax(jnp.einsum('bhnd,bhmd->bhnm', q, k) * scale, axis=-1)
    o = jnp.einsum('bhnm,bhmd->bhnd', attn, v).transpose(0, 2, 1, 3).reshape(B, N, C)
    o = o @ params['wproj'] + params['bproj']
    x1 = x + o
    xn2 = ln(x1, params['ln2_w'], params['ln2_b'])
    h = jax.nn.gelu(xn2 @ params['wfc1'] + params['bfc1'], approximate=False)
    m = h @ params['wfc2'] + params['bfc2']
    return x1 + m


if __name__ == "__main__":
    B, N, C = 2, 8, 32
    num_heads = 4
    mlp_ratio = 4.0
    hidden = int(C * mlp_ratio)

    key = jax.random.PRNGKey(0)
    keys = jax.random.split(key, 8)

    params = {
        'ln1_w': jnp.ones((C,), jnp.float32),
        'ln1_b': jnp.zeros((C,), jnp.float32),
        'wqkv':  0.02 * jax.random.normal(keys[0], (C, 3 * C), jnp.float32),
        'wproj': 0.02 * jax.random.normal(keys[1], (C, C), jnp.float32),
        'bproj': 0.02 * jax.random.normal(keys[2], (C,), jnp.float32),
        'ln2_w': jnp.ones((C,), jnp.float32),
        'ln2_b': jnp.zeros((C,), jnp.float32),
        'wfc1':  0.02 * jax.random.normal(keys[3], (C, hidden), jnp.float32),
        'bfc1':  0.02 * jax.random.normal(keys[4], (hidden,), jnp.float32),
        'wfc2':  0.02 * jax.random.normal(keys[5], (hidden, C), jnp.float32),
        'bfc2':  0.02 * jax.random.normal(keys[6], (C,), jnp.float32),
    }

    x = jax.random.normal(keys[7], (B, N, C), jnp.float32)

    out = block_forward(x, params, num_heads)
    out = jax.block_until_ready(out)

    ref = reference_forward(x, params, num_heads)
    assert jnp.allclose(out, ref, atol=1e-3, rtol=1e-3), "mismatch vs reference"

    print("KERNEL_OK")
</pallas_src>

<mosaic_0001>
module attributes {stable_mosaic.version = 11 : i64} {
  func.func @ln_qkv_kernel(%arg0: i32, %arg1: i32, %arg2: memref<1x8x32xf32, #tpu.memory_space<vmem>>, %arg3: memref<1x32xf32, #tpu.memory_space<vmem>>, %arg4: memref<1x32xf32, #tpu.memory_space<vmem>>, %arg5: memref<32x32xf32, #tpu.memory_space<vmem>>, %arg6: memref<32x32xf32, #tpu.memory_space<vmem>>, %arg7: memref<32x32xf32, #tpu.memory_space<vmem>>, %arg8: memref<1x8x32xf32, #tpu.memory_space<vmem>>, %arg9: memref<1x8x32xf32, #tpu.memory_space<vmem>>, %arg10: memref<1x8x32xf32, #tpu.memory_space<vmem>>) attributes {dimension_semantics = [#tpu.dimension_semantics<parallel>, #tpu.dimension_semantics<parallel>], iteration_bounds = array<i64: 2, 1>, scalar_prefetch = 0 : i64, scratch_operands = 0 : i64, tpu.core_type = #tpu.core_type<tc>, window_params = [{transform_indices = @transform_0, window_bounds = array<i64: 1, 8, 32>}, {pipeline_mode = #tpu.pipeline_mode<synchronous>, transform_indices = @transform_1, window_bounds = array<i64: 1, 32>}, {pipeline_mode = #tpu.pipeline_mode<synchronous>, transform_indices = @transform_2, window_bounds = array<i64: 1, 32>}, {pipeline_mode = #tpu.pipeline_mode<synchronous>, transform_indices = @transform_3, window_bounds = array<i64: 32, 32>}, {pipeline_mode = #tpu.pipeline_mode<synchronous>, transform_indices = @transform_4, window_bounds = array<i64: 32, 32>}, {pipeline_mode = #tpu.pipeline_mode<synchronous>, transform_indices = @transform_5, window_bounds = array<i64: 32, 32>}, {transform_indices = @transform_6, window_bounds = array<i64: 1, 8, 32>}, {transform_indices = @transform_7, window_bounds = array<i64: 1, 8, 32>}, {transform_indices = @transform_8, window_bounds = array<i64: 1, 8, 32>}]} {
    %c0 = arith.constant 0 : index
    %c0_0 = arith.constant 0 : index
    %c0_1 = arith.constant 0 : index
    %0 = vector.load %arg2[%c0, %c0_0, %c0_1] : memref<1x8x32xf32, #tpu.memory_space<vmem>>, vector<1x8x32xf32>
    %1 = vector.shape_cast %0 : vector<1x8x32xf32> to vector<8x32xf32>
    %c0_2 = arith.constant 0 : index
    %c0_3 = arith.constant 0 : index
    %2 = vector.load %arg3[%c0_2, %c0_3] : memref<1x32xf32, #tpu.memory_space<vmem>>, vector<1x32xf32>
    %c0_4 = arith.constant 0 : index
    %c0_5 = arith.constant 0 : index
    %3 = vector.load %arg4[%c0_4, %c0_5] : memref<1x32xf32, #tpu.memory_space<vmem>>, vector<1x32xf32>
    %cst = arith.constant dense<0.000000e+00> : vector<8xf32>
    %4 = vector.multi_reduction <add>, %1, %cst [1] : vector<8x32xf32> to vector<8xf32>
    %5 = vector.shape_cast %4 : vector<8xf32> to vector<8x1xf32>
    %cst_6 = arith.constant 3.200000e+01 : f32
    %6 = vector.broadcast %cst_6 : f32 to vector<8x1xf32>
    %7 = arith.divf %5, %6 : vector<8x1xf32>
    %8 = vector.broadcast %7 : vector<8x1xf32> to vector<8x32xf32>
    %9 = arith.subf %1, %8 : vector<8x32xf32>
    %10 = arith.mulf %9, %9 : vector<8x32xf32>
    %cst_7 = arith.constant dense<0.000000e+00> : vector<8xf32>
    %11 = vector.multi_reduction <add>, %10, %cst_7 [1] : vector<8x32xf32> to vector<8xf32>
    %12 = vector.shape_cast %11 : vector<8xf32> to vector<8x1xf32>
    %cst_8 = arith.constant 3.200000e+01 : f32
    %13 = vector.broadcast %cst_8 : f32 to vector<8x1xf32>
    %14 = arith.divf %12, %13 : vector<8x1xf32>
    %cst_9 = arith.constant 9.99999997E-7 : f32
    %15 = vector.broadcast %cst_9 : f32 to vector<8x1xf32>
    %16 = arith.addf %14, %15 : vector<8x1xf32>
    %17 = math.rsqrt %16 : vector<8x1xf32>
    %18 = vector.broadcast %17 : vector<8x1xf32> to vector<8x32xf32>
    %19 = arith.mulf %9, %18 : vector<8x32xf32>
    %20 = vector.broadcast %2 : vector<1x32xf32> to vector<8x32xf32>
    %21 = arith.mulf %19, %20 : vector<8x32xf32>
    %22 = vector.broadcast %3 : vector<1x32xf32> to vector<8x32xf32>
    %23 = arith.addf %21, %22 : vector<8x32xf32>
    %c0_10 = arith.constant 0 : index
    %c0_11 = arith.constant 0 : index
    %24 = vector.load %arg5[%c0_10, %c0_11] : memref<32x32xf32, #tpu.memory_space<vmem>>, vector<32x32xf32>
    %cst_12 = arith.constant dense<0.000000e+00> : vector<8x32xf32>
    %25 = tpu.matmul %23, %24, %cst_12 {dimension_numbers = #tpu.dot_dimension_numbers<[1], [0], [0], [1], [0, 0, 1, 1], [], []>} : vector<8x32xf32>, vector<32x32xf32>, vector<8x32xf32> -> vector<8x32xf32>
    %c0_13 = arith.constant 0 : index
    %c0_14 = arith.constant 0 : index
    %c0_15 = arith.constant 0 : index
    %26 = vector.load %arg8[%c0_13, %c0_14, %c0_15] : memref<1x8x32xf32, #tpu.memory_space<vmem>>, vector<1x8x32xf32>
    %27 = vector.shape_cast %26 : vector<1x8x32xf32> to vector<8x32xf32>
    %28 = vector.shape_cast %25 : vector<8x32xf32> to vector<1x8x32xf32>
    tpu.vector_store %arg8[%c0_13, %c0_14, %c0_15], %28 {strides = array<i32>} : memref<1x8x32xf32, #tpu.memory_space<vmem>>, vector<1x8x32xf32>,
    %c0_16 = arith.constant 0 : index
    %c0_17 = arith.constant 0 : index
    %29 = vector.load %arg6[%c0_16, %c0_17] : memref<32x32xf32, #tpu.memory_space<vmem>>, vector<32x32xf32>
    %cst_18 = arith.constant dense<0.000000e+00> : vector<8x32xf32>
    %30 = tpu.matmul %23, %29, %cst_18 {dimension_numbers = #tpu.dot_dimension_numbers<[1], [0], [0], [1], [0, 0, 1, 1], [], []>} : vector<8x32xf32>, vector<32x32xf32>, vector<8x32xf32> -> vector<8x32xf32>
    %c0_19 = arith.constant 0 : index
    %c0_20 = arith.constant 0 : index
    %c0_21 = arith.constant 0 : index
    %31 = vector.load %arg9[%c0_19, %c0_20, %c0_21] : memref<1x8x32xf32, #tpu.memory_space<vmem>>, vector<1x8x32xf32>
    %32 = vector.shape_cast %31 : vector<1x8x32xf32> to vector<8x32xf32>
    %33 = vector.shape_cast %30 : vector<8x32xf32> to vector<1x8x32xf32>
    tpu.vector_store %arg9[%c0_19, %c0_20, %c0_21], %33 {strides = array<i32>} : memref<1x8x32xf32, #tpu.memory_space<vmem>>, vector<1x8x32xf32>,
    %c0_22 = arith.constant 0 : index
    %c0_23 = arith.constant 0 : index
    %34 = vector.load %arg7[%c0_22, %c0_23] : memref<32x32xf32, #tpu.memory_space<vmem>>, vector<32x32xf32>
    %cst_24 = arith.constant dense<0.000000e+00> : vector<8x32xf32>
    %35 = tpu.matmul %23, %34, %cst_24 {dimension_numbers = #tpu.dot_dimension_numbers<[1], [0], [0], [1], [0, 0, 1, 1], [], []>} : vector<8x32xf32>, vector<32x32xf32>, vector<8x32xf32> -> vector<8x32xf32>
    %c0_25 = arith.constant 0 : index
    %c0_26 = arith.constant 0 : index
    %c0_27 = arith.constant 0 : index
    %36 = vector.load %arg10[%c0_25, %c0_26, %c0_27] : memref<1x8x32xf32, #tpu.memory_space<vmem>>, vector<1x8x32xf32>
    %37 = vector.shape_cast %36 : vector<1x8x32xf32> to vector<8x32xf32>
    %38 = vector.shape_cast %35 : vector<8x32xf32> to vector<1x8x32xf32>
    tpu.vector_store %arg10[%c0_25, %c0_26, %c0_27], %38 {strides = array<i32>} : memref<1x8x32xf32, #tpu.memory_space<vmem>>, vector<1x8x32xf32>,
    return
  }
  func.func @transform_0(%arg0: i32, %arg1: i32) -> (i32, i32, i32) {
    %c0_i32 = arith.constant 0 : i32
    %c0_i32_0 = arith.constant 0 : i32
    return %arg0, %arg1, %c0_i32 : i32, i32, i32
  }
  func.func @transform_1(%arg0: i32, %arg1: i32) -> (i32, i32) {
    %c0_i32 = arith.constant 0 : i32
    %c0_i32_0 = arith.constant 0 : i32
    %c0_i32_1 = arith.constant 0 : i32
    return %c0_i32, %c0_i32_0 : i32, i32
  }
  func.func @transform_2(%arg0: i32, %arg1: i32) -> (i32, i32) {
    %c0_i32 = arith.constant 0 : i32
    %c0_i32_0 = arith.constant 0 : i32
    %c0_i32_1 = arith.constant 0 : i32
    return %c0_i32, %c0_i32_0 : i32, i32
  }
  func.func @transform_3(%arg0: i32, %arg1: i32) -> (i32, i32) {
    %c0_i32 = arith.constant 0 : i32
    %c0_i32_0 = arith.constant 0 : i32
    %c0_i32_1 = arith.constant 0 : i32
    return %c0_i32, %c0_i32_0 : i32, i32
  }
  func.func @transform_4(%arg0: i32, %arg1: i32) -> (i32, i32) {
    %c0_i32 = arith.constant 0 : i32
    %c0_i32_0 = arith.constant 0 : i32
    %c0_i32_1 = arith.constant 0 : i32
    return %c0_i32, %c0_i32_0 : i32, i32
  }
  func.func @transform_5(%arg0: i32, %arg1: i32) -> (i32, i32) {
    %c0_i32 = arith.constant 0 : i32
    %c0_i32_0 = arith.constant 0 : i32
    %c0_i32_1 = arith.constant 0 : i32
    return %c0_i32, %c0_i32_0 : i32, i32
  }
  func.func @transform_6(%arg0: i32, %arg1: i32) -> (i32, i32, i32) {
    %c0_i32 = arith.constant 0 : i32
    %c0_i32_0 = arith.constant 0 : i32
    return %arg0, %arg1, %c0_i32 : i32, i32, i32
  }
  func.func @transform_7(%arg0: i32, %arg1: i32) -> (i32, i32, i32) {
    %c0_i32 = arith.constant 0 : i32
    %c0_i32_0 = arith.constant 0 : i32
    return %arg0, %arg1, %c0_i32 : i32, i32, i32
  }
  func.func @transform_8(%arg0: i32, %arg1: i32) -> (i32, i32, i32) {
    %c0_i32 = arith.constant 0 : i32
    %c0_i32_0 = arith.constant 0 : i32
    return %arg0, %arg1, %c0_i32 : i32, i32, i32
  }
}

</mosaic_0001>

<bundles_post_ra>
// kernel: tpu_custom_call.1
= control target key start
LH: loop header
LB: loop body
LE: loop exit
PB: predicated region body
PF: predicated region fallthrough
CT: control target
= control target key end

     0   :  { %s1663_s0 = inlined_call_operand.hbm [shape: f32[2,8,32], index: 0, kind: input, shape index: {}]   ;;  %s1664_s1 = inlined_call_operand.vmem [shape: f32[1,32], index: 1, kind: input, shape index: {}]   ;;  %s1665_s2 = inlined_call_operand.vmem [shape: f32[1,32], index: 2, kind: input, shape index: {}]   ;;  %s1666_s3 = inlined_call_operand.hbm [shape: f32[32,32], index: 3, kind: input, shape index: {}]   ;;  %s1667_s4 = inlined_call_operand.hbm [shape: f32[32,32], index: 4, kind: input, shape index: {}]   ;;  %s1668_s5 = inlined_call_operand.hbm [shape: f32[32,32], index: 5, kind: input, shape index: {}]   ;;  %s1669_s6 = inlined_call_operand.hbm [shape: f32[2,8,32], index: 6, kind: output, shape index: {0}]   ;;  %s1670_s7 = inlined_call_operand.hbm [shape: f32[2,8,32], index: 7, kind: output, shape index: {1}]   ;;  %s1671_s8 = inlined_call_operand.hbm [shape: f32[2,8,32], index: 8, kind: output, shape index: {2}]  }
   0x1   :  { %1676 = sst [smem:[#allocation20_spill]] %s1666_s3 }
   0x2   :  { %1677 = sst [smem:[#allocation21_spill]] %s1667_s4 }
   0x3   :  { %1678 = sst [smem:[#allocation22_spill]] %s1668_s5 }
   0x4   :  { %14 = vsyncpa [#allocation3], 0 }
   0x5   :  { %16 = vsyncpa [#allocation3 + $0x1], 0 }
   0x6   :  { %17 = vsyncpa [#allocation6], 0 }
   0x7   :  { %18 = vsyncpa [#allocation9], 0 }
   0x8   :  { %19 = vsyncpa [#allocation4], 0 }
   0x9   :  { %21 = vsyncpa [#allocation4 + $0x1], 0 }
   0xa   :  { %22 = vsyncpa [#allocation12], 0 }
   0xb   :  { %24 = vsyncpa [#allocation12 + $0x1], 0  ;;  %s1384_s27 = smov 0   ;;  %s1386_s28 = smov 0  }
   0xc   :  { %s1388_s29 = smov 0   ;;  %s1390_s30 = smov 0  }
   0xd   :  { %s1392_s9 = smov 0   ;;  %s1394_s10 = smov 0  }
   0xe LB: > { %s1415_s11 = sadd.s32 4294967295, %s1326_s10   ;;  %s1674_s12 = sadd.s32 4294967294, %s1326_s10   ;;  %s1326_s10 = sphi %s1394_s10, %s30_s10   ;;  %s1322_s9 = sphi %s1392_s9, %s1703_s9   ;;  %s1318_s30 = sphi %s1390_s30, %s1702_s30   ;;  %s1314_s29 = sphi %s1388_s29, %s1701_s29   ;;  %s1310_s28 = sphi %s1386_s28, %s1700_s28   ;;  %s1306_s27 = sphi %s1384_s27, %s1699_s27  }
   0xf   : > { %p64_p0 = scmp.ne.s32.totalorder %s1310_s28, %s1306_s27  ;;  %p1672_p1 = scmp.eq.s32.totalorder %s1415_s11, 0 }
  0x10   : > { %p201_p3 = scmp.eq.s32.totalorder %s1674_s12, 1  ;;  %p891_p5 = scmp.ge.s32.totalorder %s1326_s10, 1 }
  0x11   : > { %p1426_p4 = por %p1672_p1, %p64_p0  ;;  %p264_p7 = scmp.lt.s32.totalorder %s1326_s10, 3 }
  0x12   : > { %p1431_p6 = por %p201_p3, %p64_p0  ;;  %s1328_s16 = smov [#allocation5]  }
  0x13   : > { %s1679_s13 = scalar_select %p1426_p4, 1, 0 }
  0x14   : > { %s1680_s14 = scalar_select %p1431_p6, 1, 0 }
  0x15   : > { %p1436_p8 = pnand %p891_p5, %p264_p7  ;;  %s282_s17 = sshll.u32 %s1328_s16, 4  ;;  %s283_s17 = int_to_ptr.vmem [resolvable:$true] %s282_s17 }
  0x16   : > { %s1329_s19 = smov [#allocation7]   ;;  %s1330_s21 = smov [#allocation8]  }
  0x17   : > { %p987_p9 = pneg %p1436_p8  ;;  %s295_s20 = sshll.u32 %s1329_s19, 4  ;;  %s296_s20 = int_to_ptr.vmem [resolvable:$true] %s295_s20 }
  0x18   : > { %s308_s22 = sshll.u32 %s1330_s21, 4  ;;  %s1087_s23 = scalar_lea.vmem %s283_s17, 512  ;;  %s309_s22 = int_to_ptr.vmem [resolvable:$true] %s308_s22 }
  0x19   : > { %p1445_p11 = pnand %p987_p9, %p1672_p1  ;;  %p1088_p13 = scmp.ne.s32.totalorder %s283_s17, %s1087_s23 }
  0x1a   : > { %p1095_p5 = scmp.lt.s32.totalorder %s283_s17, %s283_s17  ;;  %p1096_p7 = scmp.lt.s32.totalorder %s1087_s23, %s1087_s23 }
  0x1b   : > { %p1078_p12 = pneg %p1445_p11 }
  0x1c   : > { %p1097_p9 = por %p1096_p7, %p1095_p5 }
  0x1d   : > { %p1090_p0 = pnand %p1088_p13, %p1078_p12 }
  0x1f   : > { %p1091_p3 = pneg %p1090_p0 }
  0x21   : > { %p1098_p10 = pnand %p1097_p9, %p1091_p3 }
  0x23   : > { %1101 = shalt.err (!%p1098_p10)
}
  0x24   : > { %s1331_s24 = smov 128   ;;  %s1332_s25 = smov 8  }
  0x25   : > { %s1683_s3 = sld [smem:[#allocation20_spill]]  ;;  %s1113_s19 = scalar_lea.vmem %s296_s20, 512 }
  0x26   : > { %p1114_p1 = scmp.ne.s32.totalorder %s296_s20, %s1113_s19  ;;  %p1121_p2 = scmp.lt.s32.totalorder %s296_s20, %s296_s20 }
  0x27   : > { %p1122_p6 = scmp.lt.s32.totalorder %s1113_s19, %s1113_s19 }
  0x28   : > { %p1116_p13 = pnand %p1114_p1, %p1078_p12 }
  0x29   : > { %p1123_p5 = por %p1122_p6, %p1121_p2 }
  0x2a   : > { %p1117_p0 = pneg %p1116_p13 }
  0x2b   : > { %990 = dma.hbm_to_vmem [thread:$0]  (!%p1445_p11), %s1683_s3, 512, %s283_s17, [#allocation6], %s1331_s24, %s1331_s24, %s1332_s25  }
  0x2c   : > { %p1124_p3 = pnand %p1123_p5, %p1117_p0 }
  0x2e   : > { %1127 = shalt.err (!%p1124_p3)
}
  0x2f   : > { %s1684_s4 = sld [smem:[#allocation21_spill]]  ;;  %s1139_s17 = scalar_lea.vmem %s309_s22, 512 }
  0x30   : > { %p1140_p10 = scmp.ne.s32.totalorder %s309_s22, %s1139_s17  ;;  %p1147_p9 = scmp.lt.s32.totalorder %s309_s22, %s309_s22 }
  0x31   : > { %p1148_p13 = scmp.lt.s32.totalorder %s1139_s17, %s1139_s17 }
  0x32   : > { %p1142_p7 = pnand %p1140_p10, %p1078_p12 }
  0x33   : > { %p1149_p4 = por %p1148_p13, %p1147_p9 }
  0x34   : > { %p1143_p1 = pneg %p1142_p7 }
  0x35   : > { %993 = dma.hbm_to_vmem [thread:$0]  (!%p1445_p11), %s1684_s4, 512, %s296_s20, [#allocation6], %s1331_s24, %s1331_s24, %s1332_s25  }
  0x36   : > { %p1150_p2 = pnand %p1149_p4, %p1143_p1 }
  0x38   : > { %1153 = shalt.err (!%p1150_p2)
}
  0x39   : > { %s1685_s5 = sld [smem:[#allocation22_spill]]  ;;  %s51_s20 = sadd.s32 1, %s1314_s29 }
  0x3a   : > { %s42_s19 = sadd.s32 1, %s1322_s9  ;;  %p58_p4 = scmp.ne.s32.totalorder %s1314_s29, %s1310_s28 }
  0x3b   : > { %p44_p6 = scmp.ge.s32.totalorder %s42_s19, 2  ;;  %p59_p12 = scmp.eq.s32.totalorder %s1326_s10, 0 }
  0x3c   : > { %p1686_p0 = scmp.eq.s32.totalorder %s1415_s11, 1  ;;  %p1014_p3 = scmp.lt.s32.totalorder %s1326_s10, 2 }
  0x3d   : > { %s1705_s19 = smov (%p44_p6, %s42_s19), 0  ;;  %p60_p10 = por %p59_p12, %p58_p4 }
  0x3e   : > { %p1482_p5 = por %p1686_p0, %p58_p4  ;;  %1688 = sst [smem:[#allocation19_spill]] %s1705_s19 }
  0x3f   : > { %996 = dma.hbm_to_vmem [thread:$0]  (!%p1445_p11), %s1685_s5, 512, %s309_s22, [#allocation9], %s1331_s24, %s1331_s24, %s1332_s25  }
  0x40   : > { %s322_s21 = sand.u32 1, %s1314_s29   ;;  %s46_s23 = ssub.s32 %s1322_s9, %s1705_s19 }
  0x41   : > { %p49_p7 = scmp.eq.s32.totalorder %s46_s23, 0  ;;  %s896_s22 = sshll.u32 %s322_s21, 3 }
  0x42   : > { %s897_s24 = sshll.u32 %s1322_s9, 7  ;;  %s326_s12 = scalar_lea.vmem [#allocation2], %s896_s22 }
  0x43   : > { %s1494_s25 = scalar_select %p49_p7, %s1314_s29, %s51_s20  }
  0x44   : > { %s332_s16 = scalar_lea.hbm %s1663_s0, %s897_s24  ;;  %s334_s3 = sshll.u32 %s326_s12, 4  ;;  %s335_s3 = int_to_ptr.vmem [resolvable:$true] %s334_s3 }
  0x45   : > { %p1501_p11 = pnand %p1014_p3, %p60_p10  ;;  %s323_s5 = scalar_lea.sflag [#allocation3], %s322_s21 }
  0x46   : > { %s1167_s23 = scalar_lea.vmem %s335_s3, 128  ;;  %s1333_s20 = smov [#allocation2]  }
  0x47   : > { %p1156_p1 = pneg %p1501_p11  ;;  %p1168_p9 = scmp.ne.s32.totalorder %s335_s3, %s1167_s23 }
  0x48   : > { %s1172_s19 = sshll.u32 %s1333_s20, 4  ;;  %s1173_s19 = int_to_ptr.vmem [resolvable:$false] %s1172_s19 }
  0x49   : > { %p1170_p13 = pnand %p1168_p9, %p1156_p1  ;;  %s1174_s24 = scalar_lea.vmem %s1173_s19, 256 }
  0x4a   : > { %p1175_p4 = scmp.lt.s32.totalorder %s335_s3, %s1173_s19  ;;  %p1176_p6 = scmp.lt.s32.totalorder %s1174_s24, %s1167_s23 }
  0x4b   : > { %p1171_p2 = pneg %p1170_p13 }
  0x4c   : > { %p1177_p12 = por %p1176_p6, %p1175_p4 }
  0x4e   : > { %p1178_p0 = pnand %p1177_p12, %p1171_p2 }
  0x50   : > { %1181 = shalt.err (!%p1178_p0)
}
  0x51   : > { %1000 = dma.hbm_to_vmem [thread:$0]  (!%p1501_p11), %s332_s16, 128, %s335_s3, %s323_s5  }
  0x52   : > { %343 = sbr.rel (%p1436_p8) target bundleno = 656 (0x290), region = 44  ;;  %s1512_s12 = sand.u32 (!%p1436_p8), 1, %s1310_s28  }
  0x53   : > { %s1515_s21 = sshll.u32 (!%p1436_p8), %s1512_s12, 3  ;;  %s346_s19 = scalar_lea.sflag (!%p1436_p8), [#allocation3], %s1512_s12 }
  0x54   : > { %s349_s22 = scalar_lea.vmem (!%p1436_p8), [#allocation2], %s1515_s21  ;;  %p1690_p3 = scmp.ne.s32.totalorder (!%p1436_p8), %s1679_s13, 0 }
  0x57   : > { %1285 = dma.done.wait (%p1690_p3), %s346_s19, 128  }
  0x58   : > { %1287 = vsyncadd (%p1690_p3), %s346_s19, 4294967168  ;;  %p1691_p10 = scmp.eq.s32.totalorder %s1415_s11, 0 }
  0x5a   : > { %1289 = dma.done.wait (%p1691_p10), [#allocation6], 1024   ;;  %p1692_p8 = pmov %p1691_p10 }
  0x5c   : > { %1291 = vsyncadd (%p1692_p8), [#allocation6], 4294966272  ;;  %p1693_p7 = pmov %p1692_p8 }
  0x5e   : > { %1293 = dma.done.wait (%p1693_p7), [#allocation9], 512   ;;  %p1694_p11 = pmov %p1693_p7 }
  0x5f   : > { %vm407_vm0 = vcmask 261120   ;;  %v404_v0 = vld [vmem:[%s349_s22] sm:$0xff]  ;;  %v1334_v9 = vmov 0.0   ;;  %v437_v12 = vld [vmem:[#allocation5 + $0x8] sm:$0xff]  ;;  %v436_v14 = vld [vmem:[#allocation5] sm:$0xff]  ;;  %vm1335_vm1 = vmmov 0  }
  0x60   : > { %1295 = vsyncadd (%p1694_p11), [#allocation9], 4294966784  ;;  %v408_v1 = vsel %vm407_vm0, %v404_v0, 0.0  ;;  %v439_v7 = vld [vmem:[#allocation5 + $0x18] sm:$0xff]  ;;  %934 = vmatprep.subr.mxu0 %v1334_v9  ;;  %945 = vmatprep.subr.mxu1 %v1334_v9  ;;  %v438_v10 = vld [vmem:[#allocation5 + $0x10] sm:$0xff]  ;;  %s669_s15 = sand.u32 1, %s1415_s11  }
  0x61   : > { %409 = vadd.xlane.f32.xlu0 %v408_v1  ;;  %v517_v8 = vld [vmem:[#allocation7 + $0x18] sm:$0xff]  ;;  %v516_v11 = vld [vmem:[#allocation7 + $0x10] sm:$0xff]  ;;  %935 = vmatpush3.msra.mxu0 %v439_v7  ;;  %v515_v13 = vld [vmem:[#allocation7 + $0x8] sm:$0xff]  ;;  %s1547_s17 = sshll.u32 %s1318_s30, 7  ;;  %s396_s26 = scalar_lea.vmem [#allocation11], %s1515_s21 }
  0x62   : > { %946 = vmatpush3.msra.mxu1 %v517_v8  ;;  %936 = vmatprep.subr.mxu0 %v1334_v9  ;;  %v514_v15 = vld [vmem:[#allocation7] sm:$0xff]  ;;  %v906_v20 = vld [vmem:[%s1664_s1] ss:$0 sm:$0xff]  ;;  %v592_v25 = vld [vmem:[#allocation8 + $0x18] sm:$0xff]  ;;  %s703_s16 = sshll.u32 %s396_s26, 4  ;;  %s389_s23 = scalar_lea.vmem [#allocation10], %s1515_s21  ;;  %s1557_s16 = int_to_ptr.vmem [resolvable:$true] %s703_s16 }
  0x63   : > { %947 = vmatprep.subr.mxu1 %v1334_v9  ;;  %937 = vmatpush3.msra.mxu0 %v438_v10  ;;  %v907_v22 = vld [vmem:[%s1665_s2] ss:$0 sm:$0xff]  ;;  %v590_v27 = vld [vmem:[#allocation8 + $0x8] sm:$0xff]  ;;  %v589_v28 = vld [vmem:[#allocation8] sm:$0xff]  ;;  %s689_s20 = sshll.u32 %s389_s23, 4  ;;  %s1555_s22 = scalar_lea.hbm %s1670_s7, %s1547_s17  ;;  %s1565_s20 = int_to_ptr.vmem [resolvable:$true] %s689_s20 }
  0x64   : > { %948 = vmatpush3.msra.mxu1 %v516_v11  ;;  %938 = vmatprep.subr.mxu0 %v1334_v9  ;;  %v591_v26 = vld [vmem:[#allocation8 + $0x10] sm:$0xff]  ;;  %s1563_s3 = scalar_lea.hbm %s1669_s6, %s1547_s17  ;;  %s1569_s4 = scalar_lea.sflag [#allocation12], %s669_s15 }
  0x65   : > { %949 = vmatprep.subr.mxu1 %v1334_v9  ;;  %939 = vmatpush3.msra.mxu0 %v437_v12  ;;  %s1182_s5 = scalar_lea.vmem %s1557_s16, 128  ;;  %s1336_s13 = smov [#allocation11]  }
  0x66   : > { %950 = vmatpush3.msra.mxu1 %v515_v13  ;;  %940 = vmatprep.subr.mxu0 %v1334_v9  ;;  %p1183_p1 = scmp.ne.s32.totalorder %s1557_s16, %s1182_s5  ;;  %s1186_s24 = sshll.u32 %s1336_s13, 4  ;;  %s1187_s24 = int_to_ptr.vmem [resolvable:$false] %s1186_s24 }
  0x67   : > { %951 = vmatprep.subr.mxu1 %v1334_v9  ;;  %941 = vmatpush3.msra.mxu0 %v436_v14  ;;  %s1188_s19 = scalar_lea.vmem %s1187_s24, 256  ;;  %p1189_p2 = scmp.lt.s32.totalorder %s1557_s16, %s1187_s24 }
  0x68   : > { %942 = vmatprep.mubr.msk.f32.mxu0 %vm1335_vm1, %v1334_v9  ;;  %952 = vmatpush3.msra.mxu1 %v514_v15  ;;  %p1184_p9 = pnand %p1183_p1, %p1482_p5  ;;  %p1190_p4 = scmp.lt.s32.totalorder %s1188_s19, %s1182_s5 }
  0x69   : > { %953 = vmatprep.mubr.msk.f32.mxu1 %vm1335_vm1, %v1334_v9  ;;  %956 = vmatprep.subr.mxu0 %v1334_v9 }
  0x6a   : > { %p1185_p13 = pneg %p1184_p9  ;;  %p1191_p6 = por %p1190_p4, %p1189_p2 }
  0x6c   : > { %p1192_p12 = pnand %p1191_p6, %p1185_p13 }
  0xea   : > { %v410_v2 = vpop.xlane.xlu0 %409 }
  0xeb   : > { %v412_v3 = vmul.f32 0.03125, %v410_v2 }
  0xed   : > { %v413_v4 = vsub.f32 %v404_v0, %v412_v3 }
  0xef   : > { %v414_v5 = vmul.f32 %v413_v4, %v413_v4 }
  0xf1   : > { %v415_v6 = vsel %vm407_vm0, %v414_v5, 0.0 }
  0xf2   : > { %416 = vadd.xlane.f32.xlu0 %v415_v6 }
 0x17b   : > { %v417_v16 = vpop.xlane.xlu0 %416 }
 0x17c   : > { %v418_v17 = vmul.f32 0.03125, %v417_v16 }
 0x17e   : > { %v419_v18 = vadd.f32 1e-06, %v418_v17 }
 0x180   : > { %1074 = vrsqrt.f32 %v419_v18 }
 0x18d   : > { %v1075_v19 = vpop.eup %1074 }
 0x18e   : > { %v421_v21 = vmul.f32 %v1075_v19, %v413_v4 }
 0x190   : > { %v428_v23 = vmul.f32 %v906_v20, %v421_v21 }
 0x192   : > { %v435_v24 = vadd.f32 %v907_v22, %v428_v23 }
 0x194   : > { %943 = vmatmul.mubr.msk.f32.vlgmr.msra.gmra.mxu0 %vm407_vm0, %v435_v24  ;;  %954 = vmatmul.mubr.msk.f32.vlgmr.msra.gmra.mxu1 %vm407_vm0, %v435_v24 }
 0x195   : > { %957 = vmatpush3.msra.mxu0 %v592_v25  ;;  %964 = vmatprep.mubr.msk.f32.mxu0 %vm1335_vm1, %v1334_v9 }
 0x196   : > { %958 = vmatprep.subr.mxu0 %v1334_v9 }
 0x197   : > { %959 = vmatpush3.msra.mxu0 %v591_v26 }
 0x198   : > { %960 = vmatprep.subr.mxu0 %v1334_v9 }
 0x199   : > { %961 = vmatpush3.msra.mxu0 %v590_v27 }
 0x19a   : > { %962 = vmatprep.subr.mxu0 %v1334_v9 }
 0x19b   : > { %963 = vmatpush3.msra.mxu0 %v589_v28 }
 0x19c   : > { %965 = vmatmul.mubr.msk.f32.vlgmr.msra.gmra.mxu0 %vm407_vm0, %v435_v24 }
 0x254   : > { %v509_v29 = vpop.f32.mrf.mxu0  ;;  %v584_v30 = vpop.f32.mrf.mxu1 }
 0x255   : > { %513 = vst.msk [vmem:[%s389_s23] sm:$0xff] %vm407_vm0, %v509_v29  ;;  %588 = vst.msk [vmem:[%s396_s26] sm:$0xff] %vm407_vm0, %v584_v30 }
 0x256   : > { %v944_v31 = vpop.f32.mrf.mxu0  ;;  %v955_v32 = vpop.f32.mrf.mxu1 }
 0x257   : > { %1195 = shalt.err (!%p1192_p12)
}
 0x258   : > { %s1196_s15 = scalar_lea.hbm %s1555_s22, 128  ;;  %s1200_s30 = scalar_lea.hbm %s1670_s7, 256 }
 0x259   : > { %p1197_p0 = scmp.ne.s32.totalorder %s1555_s22, %s1196_s15  ;;  %p1201_p8 = scmp.lt.s32.totalorder %s1555_s22, %s1670_s7 }
 0x25a   : > { %p1202_p7 = scmp.lt.s32.totalorder %s1200_s30, %s1196_s15 }
 0x25b   : > { %p1198_p3 = pnand %p1197_p0, %p1482_p5 }
 0x25c   : > { %p1203_p11 = por %p1202_p7, %p1201_p8 }
 0x25d   : > { %p1199_p10 = pneg %p1198_p3 }
 0x25f   : > { %p1204_p1 = pnand %p1203_p11, %p1199_p10 }
 0x261   : > { %1207 = shalt.err (!%p1204_p1)
}
 0x262   : > { %982 = dma.vmem_to_hbm [thread:$0]  (%p1482_p5), %s1557_s16, 128, %s1555_s22, %s1569_s4  }
 0x263   : > { %s665_s5 = scalar_lea.sflag [#allocation4], %s1512_s12  ;;  %s1208_s24 = scalar_lea.vmem %s1565_s20, 128 }
 0x264   : > { %p1209_p9 = scmp.ne.s32.totalorder %s1565_s20, %s1208_s24  ;;  %s1337_s19 = smov [#allocation10]  }
 0x265   : > { %s1212_s15 = sshll.u32 %s1337_s19, 4  ;;  %s1213_s15 = int_to_ptr.vmem [resolvable:$false] %s1212_s15 }
 0x266   : > { %p1210_p13 = pnand %p1209_p9, %p1482_p5  ;;  %s1214_s26 = scalar_lea.vmem %s1213_s15, 256 }
 0x267   : > { %p1215_p4 = scmp.lt.s32.totalorder %s1565_s20, %s1213_s15  ;;  %p1216_p6 = scmp.lt.s32.totalorder %s1214_s26, %s1208_s24 }
 0x268   : > { %p1211_p2 = pneg %p1210_p13 }
 0x269   : > { %p1217_p12 = por %p1216_p6, %p1215_p4 }
 0x26b   : > { %p1218_p0 = pnand %p1217_p12, %p1211_p2 }
 0x26d   : > { %1221 = shalt.err (!%p1218_p0)
}
 0x26e   : > { %s1222_s16 = scalar_lea.hbm %s1563_s3, 128  ;;  %s1226_s23 = scalar_lea.hbm %s1669_s6, 256 }
 0x26f   : > { %p1223_p3 = scmp.ne.s32.totalorder %s1563_s3, %s1222_s16  ;;  %p1227_p7 = scmp.lt.s32.totalorder %s1563_s3, %s1669_s6 }
 0x270   : > { %p1228_p11 = scmp.lt.s32.totalorder %s1226_s23, %s1222_s16 }
 0x271   : > { %p1224_p10 = pnand %p1223_p3, %p1482_p5 }
 0x272   : > { %p1229_p1 = por %p1228_p11, %p1227_p7 }
 0x273   : > { %p1225_p8 = pneg %p1224_p10 }
 0x275   : > { %p1230_p9 = pnand %p1229_p1, %p1225_p8 }
 0x277   : > { %1233 = shalt.err (!%p1230_p9)
}
 0x278   : > { %981 = dma.vmem_to_hbm [thread:$0]  (%p1482_p5), %s1565_s20, 128, %s1563_s3, %s665_s5   ;;  %v659_v33 = vpop.f32.mrf.mxu0 }
 0x279   : > { %s403_s13 = scalar_lea.vmem [#allocation13], %s1515_s21  ;;  %s1618_s26 = scalar_lea.hbm %s1671_s8, %s1547_s17 }
 0x27a   : > { %s717_s24 = sshll.u32 %s403_s13, 4  ;;  %663 = vst.msk [vmem:[%s403_s13] sm:$0xff] %vm407_vm0, %v659_v33  ;;  %v966_v34 = vpop.f32.mrf.mxu0  ;;  %s1338_s12 = smov [#allocation13]   ;;  %s718_s24 = int_to_ptr.vmem [resolvable:$true] %s717_s24 }
 0x27b   : > { %s1234_s16 = scalar_lea.vmem %s718_s24, 128  ;;  %s1238_s22 = sshll.u32 %s1338_s12, 4  ;;  %s1239_s22 = int_to_ptr.vmem [resolvable:$false] %s1238_s22 }
 0x27c   : > { %p1235_p13 = scmp.ne.s32.totalorder %s718_s24, %s1234_s16  ;;  %s1240_s21 = scalar_lea.vmem %s1239_s22, 256 }
 0x27d   : > { %p1241_p6 = scmp.lt.s32.totalorder %s718_s24, %s1239_s22  ;;  %p1242_p12 = scmp.lt.s32.totalorder %s1240_s21, %s1234_s16 }
 0x27e   : > { %p1236_p2 = pnand %p1235_p13, %p1482_p5 }
 0x27f   : > { %p1243_p0 = por %p1242_p12, %p1241_p6 }
 0x280   : > { %p1237_p4 = pneg %p1236_p2 }
 0x282   : > { %p1244_p3 = pnand %p1243_p0, %p1237_p4 }
 0x284   : > { %1247 = shalt.err (!%p1244_p3)
}
 0x285   : > { %s1248_s17 = scalar_lea.hbm %s1618_s26, 128  ;;  %s1252_s5 = scalar_lea.hbm %s1671_s8, 256 }
 0x286   : > { %p1249_p10 = scmp.ne.s32.totalorder %s1618_s26, %s1248_s17  ;;  %p1253_p11 = scmp.lt.s32.totalorder %s1618_s26, %s1671_s8 }
 0x287   : > { %p1254_p1 = scmp.lt.s32.totalorder %s1252_s5, %s1248_s17 }
 0x288   : > { %p1250_p8 = pnand %p1249_p10, %p1482_p5 }
 0x289   : > { %p1255_p9 = por %p1254_p1, %p1253_p11 }
 0x28a   : > { %p1251_p7 = pneg %p1250_p8 }
 0x28c   : > { %p1256_p13 = pnand %p1255_p9, %p1251_p7 }
 0x28e   : > { %1259 = shalt.err (!%p1256_p13)
}
 0x28f   : > { %983 = dma.vmem_to_hbm [thread:$0]  (%p1482_p5), %s718_s24, 128, %s1618_s26, %s1569_s4  }
 0x290 PF: > { %s729_s11 = sand.u32 1, %s1306_s27   ;;  %p1695_p2 = scmp.ne.s32.totalorder %s1680_s14, 0 }
 0x291   : > { %p1696_p4 = scmp.ge.s32.totalorder %s1326_s10, 2  ;;  %s730_s13 = scalar_lea.sflag [#allocation4], %s729_s11 }
 0x293   : > { %p1002_p6 = pnand %p1696_p4, %p1695_p2 }
 0x295   : > { %p1003_p12 = pneg %p1002_p6 }
 0x297   : > { %1297 = dma.done.wait (%p1003_p12), %s730_s13, 128  }
 0x298   : > { %1299 = vsyncadd (%p1003_p12), %s730_s13, 4294967168  ;;  %s1697_s19 = sadd.s32 4294967294, %s1326_s10  }
 0x299   : > { %s738_s15 = sand.u32 1, %s1697_s19  }
 0x29a   : > { %s739_s16 = scalar_lea.sflag [#allocation12], %s738_s15 }
 0x29b   : > { %1301 = dma.done.wait (%p1003_p12), %s739_s16, 256  }
 0x29c   : > { %1303 = vsyncadd (%p1003_p12), %s739_s16, 4294967040  ;;  %s30_s10 = sadd.s32 1, %s1326_s10   ;;  %s1698_s14 = sld [smem:[#allocation19_spill]] }
 0x29d   : > { %p27_p5 = scmp.ge.s32.totalorder %s30_s10, 4   ;;  %s1699_s27 = smov %s1310_s28 }
 0x29e   : > { %s1700_s28 = smov %s1314_s29  ;;  %s1701_s29 = smov %s1494_s25 }
 0x29f   : > { %s1702_s30 = smov %s1322_s9  ;;  %29 = sbr.rel (!%p27_p5) target bundleno = 14 (0xe), region = 133 }
 0x2a2   : > { %s1703_s9 = smov %s1698_s14 }
 0x2a4   :  { %753 = vsyncpa [#allocation3], 1 }
 0x2a5   :  { %755 = vsyncpa [#allocation3 + $0x1], 1 }
 0x2a6   :  { %756 = vsyncpa [#allocation6], 1 }
 0x2a7   :  { %757 = vsyncpa [#allocation9], 1 }
 0x2a8   :  { %758 = vsyncpa [#allocation4], 1 }
 0x2a9   :  { %760 = vsyncpa [#allocation4 + $0x1], 1 }
 0x2aa   :  { %761 = vsyncpa [#allocation12], 1 }
 0x2ab   :  { %763 = vsyncpa [#allocation12 + $0x1], 1 }

</bundles_post_ra>
